<compile_context>
chip_gen: v6e
topology: v6e:2x2x1
jax: 0.10.0
libtpu: 0.0.40
codegen_flags: <defaults>
</compile_context>

<pallas_src>
import functools

import numpy as np
import jax
import jax.numpy as jnp
from jax.experimental import pallas as pl
from jax.experimental.pallas import tpu as pltpu


def _round_up(x, m):
    return (x + m - 1) // m * m


def _pick_tile_rows(rows, D, itemsize, *, vmem_budget_bytes=8 << 20, cap=4096):
    """Largest row tile (multiple of 8) whose double-buffered footprint
    (2 inputs x 2 pipeline buffers) stays within a conservative VMEM budget."""
    per_row_bytes = 4 * D * itemsize          # 2 inputs x 2 pipeline buffers
    t = max(8, min(cap, vmem_budget_bytes // max(per_row_bytes, 1)))
    t = (t // 8) * 8
    return int(min(t, _round_up(rows, 8)))


def _fused_similarity_loss_kernel(u_ref, s_ref, out_ref, acc_ref, *,
                                  n_pos, n_valid, pos_w, neg_w, const):
    """Row-tiled fused positive+negative similarity loss.

    u_ref, s_ref : (TILE_R, D) tiles of the fused [pos; neg] embedding streams
    out_ref      : (1,) f32 in SMEM — final scalar loss
    acc_ref      : (TILE_R, 1) f32 VMEM accumulator (per-row-slot partial sums)
    """
    i = pl.program_id(0)
    tile_r = u_ref.shape[0]

    @pl.when(i == 0)
    def _init():
        acc_ref[...] = jnp.zeros_like(acc_ref)

    # Widen inside the kernel: inputs travel HBM->VMEM in native dtype
    # (f32 math for the product — safe on v5e which has no bf16 VALU).
    u = u_ref[...].astype(jnp.float32)
    s = s_ref[...].astype(jnp.float32)
    x = jnp.sum(u * s, axis=-1, keepdims=True)                 # (TILE_R, 1)

    # Global row index -> positive / negative / padding classification.
    row = i * tile_r + jax.lax.broadcasted_iota(jnp.int32, (tile_r, 1), 0)
    is_pos = row < n_pos
    is_valid = row < n_valid

    # Per-row weight folds the two means (and the sign of the positive term):
    #   positive rows: -1/B,  negative rows: +1/(B*S),  padding rows: 0.
    w = jnp.where(is_pos, jnp.float32(pos_w),
                  jnp.where(is_valid, jnp.float32(neg_w), jnp.float32(0.0)))
    # Positive rows use sigmoid(+x), negative rows sigmoid(-x).
    x_eff = jnp.where(is_pos, x, -x)

    # Keep the PyTorch eps-clamped form: log(sigmoid(+-x) + 1e-8).
    term = jnp.log(jax.nn.sigmoid(x_eff) + jnp.float32(const))
    acc_ref[...] += w * term

    @pl.when(i == pl.num_programs(0) - 1)
    def _finalize():
        out_ref[0] = jnp.sum(acc_ref[...])


def similarity_loss_use_sigmoid_pallas(user_emb, subreddit_emb,
                                       neg_user_emb, neg_sub_emb):
    """Scalar loss matching SimilarityLossUseSigmoid.forward (positive loss +
    the module's un-negated negative term).  Embeddings may be f32 or bf16;
    widening happens inside the kernel."""
    B, D = user_emb.shape
    n_neg = neg_user_emb.shape[0]            # == B * negative_samples
    rows = B + n_neg

    # Fuse the positive and negative streams into two DMA inputs.
    u = jnp.concatenate([user_emb, neg_user_emb], axis=0)
    s = jnp.concatenate([subreddit_emb, neg_sub_emb], axis=0)

    itemsize = jnp.dtype(u.dtype).itemsize
    tile_rows = _pick_tile_rows(rows, D, itemsize)
    padded_rows = _round_up(rows, tile_rows)
    if padded_rows != rows:
        pad = padded_rows - rows
        u = jnp.pad(u, ((0, pad), (0, 0)))
        s = jnp.pad(s, ((0, pad), (0, 0)))
    n_tiles = padded_rows // tile_rows

    kernel = functools.partial(
        _fused_similarity_loss_kernel,
        n_pos=B,
        n_valid=rows,
        pos_w=-1.0 / B,
        neg_w=1.0 / n_neg,
        const=1e-8,
    )

    cost = pl.CostEstimate(
        flops=2 * padded_rows * D + 4 * padded_rows,
        transcendentals=2 * padded_rows,          # sigmoid (exp) + log per row
        bytes_accessed=2 * padded_rows * D * itemsize + 4,
    )

    out = pl.pallas_call(
        kernel,
        out_shape=jax.ShapeDtypeStruct((1,), jnp.float32),
        grid=(n_tiles,),
        in_specs=[
            pl.BlockSpec((tile_rows, D), lambda i: (i, 0)),
            pl.BlockSpec((tile_rows, D), lambda i: (i, 0)),
        ],
        # Scalar result in SMEM: avoids a masked 1-lane VMEM store/writeback.
        out_specs=pl.BlockSpec(memory_space=pltpu.MemorySpace.SMEM),
        scratch_shapes=[pltpu.VMEM((tile_rows, 1), jnp.float32)],
        compiler_params=pltpu.CompilerParams(
            # Reduction over the row-tile axis into a shared accumulator.
            dimension_semantics=("arbitrary",)),
        cost_estimate=cost,
    )(u, s)
    return out[0]


if __name__ == "__main__":
    # ---- deterministic synthetic setup -----------------------------------
    negative_samples = 5
    batch = 8              # users in this batch
    D = 32                 # embedding dim
    n_total_users = 16
    n_total_subreddits = 20

    key = jax.random.PRNGKey(0)
    k1, k2 = jax.random.split(key, 2)
    total_user_embeddings = jax.random.normal(k1, (n_total_users, D), jnp.float32)
    total_subreddit_embeddings = jax.random.normal(k2, (n_total_subreddits, D), jnp.float32)

    # batch of (user, subreddit) positive pairs
    rng = np.random.RandomState(0)
    batch_users = rng.permutation(n_total_users)[:batch]
    batch_subreddits = rng.randint(0, n_total_subreddits, size=batch)

    user_embeddings = total_user_embeddings[jnp.asarray(batch_users)]
    subreddit_embeddings = total_subreddit_embeddings[jnp.asarray(batch_subreddits)]

    # synthetic "graph": user u interacts with subreddits {u%S, (u+3)%S, (u+7)%S}
    # TODO(synk): DGL graph.successors() traversal + torch.randperm negative
    # sampling are data-dependent host logic with no Pallas equivalent; they
    # are emulated deterministically host-side and the kernel consumes the
    # gathered embedding rows.
    neg_rows_u = []
    neg_rows_s = []
    for u in batch_users:
        connected = {int(u) % n_total_subreddits,
                     (int(u) + 3) % n_total_subreddits,
                     (int(u) + 7) % n_total_subreddits}
        candidates = sorted(set(range(n_total_subreddits)) - connected)
        perm = rng.permutation(len(candidates))[:negative_samples]
        sampled = [candidates[i] for i in perm]
        neg_rows_s.extend(sampled)
        neg_rows_u.extend([int(u)] * negative_samples)

    neg_user_emb = total_user_embeddings[jnp.asarray(neg_rows_u)]       # [B*S, D]
    neg_sub_emb = total_subreddit_embeddings[jnp.asarray(neg_rows_s)]   # [B*S, D]

    # ---- run kernel -------------------------------------------------------
    loss = similarity_loss_use_sigmoid_pallas(
        user_embeddings, subreddit_embeddings, neg_user_emb, neg_sub_emb)
    loss = jax.block_until_ready(loss)

    # ---- pure-JAX reference check (mirrors the PyTorch forward) -----------
    const = 1e-8
    pos_ref = jnp.mean(-jnp.log(jax.nn.sigmoid(
        jnp.sum(user_embeddings * subreddit_embeddings, axis=-1)) + const))
    neg_prod = jnp.sum(neg_user_emb * neg_sub_emb, axis=-1).reshape(batch, negative_samples)
    neg_ref = jnp.mean(jnp.mean(jnp.log(jax.nn.sigmoid(-neg_prod) + const), axis=-1))
    ref = pos_ref + neg_ref
    assert jnp.allclose(loss, ref, rtol=1e-5, atol=1e-5), (loss, ref)

    print("KERNEL_OK")
</pallas_src>

<mosaic_0001>
module attributes {stable_mosaic.version = 11 : i64} {
  func.func @_fused_similarity_loss_kernel(%arg0: i32, %arg1: memref<48x32xf32, #tpu.memory_space<vmem>>, %arg2: memref<48x32xf32, #tpu.memory_space<vmem>>, %arg3: memref<1xf32, #tpu.memory_space<smem>>, %arg4: memref<48x1xf32, #tpu.memory_space<vmem>>) attributes {dimension_semantics = [#tpu.dimension_semantics<arbitrary>], iteration_bounds = array<i64: 1>, scalar_prefetch = 0 : i64, scratch_operands = 1 : i64, tpu.core_type = #tpu.core_type<tc>, window_params = [{transform_indices = @transform_0, window_bounds = array<i64: 48, 32>}, {transform_indices = @transform_1, window_bounds = array<i64: 48, 32>}, {transform_indices = @transform_2, window_bounds = array<i64: 1>}]} {
    %c0_i32 = arith.constant 0 : i32
    %0 = arith.cmpi eq, %arg0, %c0_i32 : i32
    %1 = arith.extui %0 : i1 to i32
    %c0_i32_0 = arith.constant 0 : i32
    %2 = arith.cmpi ne, %1, %c0_i32_0 : i32
    scf.if %2 {
      %cst_17 = arith.constant 0.000000e+00 : f32
      %39 = vector.broadcast %cst_17 : f32 to vector<48x1xf32>
      %c0_18 = arith.constant 0 : index
      %c0_19 = arith.constant 0 : index
      %40 = vector.load %arg4[%c0_18, %c0_19] : memref<48x1xf32, #tpu.memory_space<vmem>>, vector<48x1xf32>
      tpu.vector_store %arg4[%c0_18, %c0_19], %39 {strides = array<i32>} : memref<48x1xf32, #tpu.memory_space<vmem>>, vector<48x1xf32>,
    } else {
    }
    %c0 = arith.constant 0 : index
    %c0_1 = arith.constant 0 : index
    %3 = vector.load %arg1[%c0, %c0_1] : memref<48x32xf32, #tpu.memory_space<vmem>>, vector<48x32xf32>
    %c0_2 = arith.constant 0 : index
    %c0_3 = arith.constant 0 : index
    %4 = vector.load %arg2[%c0_2, %c0_3] : memref<48x32xf32, #tpu.memory_space<vmem>>, vector<48x32xf32>
    %5 = arith.mulf %3, %4 : vector<48x32xf32>
    %cst = arith.constant dense<0.000000e+00> : vector<48xf32>
    %6 = vector.multi_reduction <add>, %5, %cst [1] : vector<48x32xf32> to vector<48xf32>
    %7 = vector.shape_cast %6 : vector<48xf32> to vector<48x1xf32>
    %c48_i32 = arith.constant 48 : i32
    %8 = arith.muli %arg0, %c48_i32 : i32
    %9 = tpu.iota {dimensions = array<i32: 0>} : vector<48x1xi32>
    %10 = vector.broadcast %8 : i32 to vector<48x1xi32>
    %11 = arith.addi %10, %9 : vector<48x1xi32>
    %c8_i32 = arith.constant 8 : i32
    %12 = vector.broadcast %c8_i32 : i32 to vector<48x1xi32>
    %13 = arith.cmpi slt, %11, %12 : vector<48x1xi32>
    %c48_i32_4 = arith.constant 48 : i32
    %14 = vector.broadcast %c48_i32_4 : i32 to vector<48x1xi32>
    %15 = arith.cmpi slt, %11, %14 : vector<48x1xi32>
    %cst_5 = arith.constant 2.500000e-02 : f32
    %cst_6 = arith.constant 0.000000e+00 : f32
    %16 = vector.broadcast %cst_5 : f32 to vector<48x1xf32>
    %17 = vector.broadcast %cst_6 : f32 to vector<48x1xf32>
    %18 = arith.select %15, %16, %17 : vector<48x1xi1>, vector<48x1xf32>
    %cst_7 = arith.constant -1.250000e-01 : f32
    %19 = vector.broadcast %cst_7 : f32 to vector<48x1xf32>
    %20 = arith.select %13, %19, %18 : vector<48x1xi1>, vector<48x1xf32>
    %cst_8 = arith.constant 0.000000e+00 : f32
    %21 = vector.broadcast %cst_8 : f32 to vector<48x1xf32>
    %22 = arith.subf %21, %7 : vector<48x1xf32>
    %23 = arith.select %13, %7, %22 : vector<48x1xi1>, vector<48x1xf32>
    %24 = arith.negf %23 : vector<48x1xf32>
    %25 = math.exp %24 : vector<48x1xf32>
    %cst_9 = arith.constant 1.000000e+00 : f32
    %26 = vector.broadcast %cst_9 : f32 to vector<48x1xf32>
    %27 = arith.addf %26, %25 : vector<48x1xf32>
    %28 = arith.divf %26, %27 : vector<48x1xf32>
    %cst_10 = arith.constant 9.99999993E-9 : f32
    %29 = vector.broadcast %cst_10 : f32 to vector<48x1xf32>
    %30 = arith.addf %28, %29 : vector<48x1xf32>
    %31 = math.log %30 : vector<48x1xf32>
    %c0_11 = arith.constant 0 : index
    %c0_12 = arith.constant 0 : index
    %32 = vector.load %arg4[%c0_11, %c0_12] : memref<48x1xf32, #tpu.memory_space<vmem>>, vector<48x1xf32>
    %33 = arith.mulf %20, %31 : vector<48x1xf32>
    %34 = arith.addf %32, %33 : vector<48x1xf32>
    %c0_13 = arith.constant 0 : index
    %c0_14 = arith.constant 0 : index
    %35 = vector.load %arg4[%c0_13, %c0_14] : memref<48x1xf32, #tpu.memory_space<vmem>>, vector<48x1xf32>
    tpu.vector_store %arg4[%c0_13, %c0_14], %34 {strides = array<i32>} : memref<48x1xf32, #tpu.memory_space<vmem>>, vector<48x1xf32>,
    %c0_i32_15 = arith.constant 0 : i32
    %36 = arith.cmpi eq, %arg0, %c0_i32_15 : i32
    %37 = arith.extui %36 : i1 to i32
    %c0_i32_16 = arith.constant 0 : i32
    %38 = arith.cmpi ne, %37, %c0_i32_16 : i32
    scf.if %38 {
      %c0_17 = arith.constant 0 : index
      %c0_18 = arith.constant 0 : index
      %39 = vector.load %arg4[%c0_17, %c0_18] : memref<48x1xf32, #tpu.memory_space<vmem>>, vector<48x1xf32>
      %40 = vector.shape_cast %39 : vector<48x1xf32> to vector<1x48x1xf32>
      %cst_19 = arith.constant dense<0.000000e+00> : vector<1xf32>
      %41 = vector.multi_reduction <add>, %40, %cst_19 [1, 2] : vector<1x48x1xf32> to vector<1xf32>
      %42 = vector.shape_cast %41 : vector<1xf32> to vector<1x1x1xf32>
      %43 = vector.extract %42[0, 0, 0] : f32 from vector<1x1x1xf32>
      %c0_20 = arith.constant 0 : index
      %44 = memref.load %arg3[%c0_20] : memref<1xf32, #tpu.memory_space<smem>>
      memref.store %43, %arg3[%c0_20] : memref<1xf32, #tpu.memory_space<smem>>
    } else {
    }
    return
  }
  func.func @transform_0(%arg0: i32) -> (i32, i32) {
    %c0_i32 = arith.constant 0 : i32
    %c0_i32_0 = arith.constant 0 : i32
    return %arg0, %c0_i32 : i32, i32
  }
  func.func @transform_1(%arg0: i32) -> (i32, i32) {
    %c0_i32 = arith.constant 0 : i32
    %c0_i32_0 = arith.constant 0 : i32
    return %arg0, %c0_i32 : i32, i32
  }
  func.func @transform_2(%arg0: i32) -> i32 {
    %c0_i32 = arith.constant 0 : i32
    %c0_i32_0 = arith.constant 0 : i32
    return %c0_i32 : i32
  }
}

</mosaic_0001>

<bundles_post_ra>
// kernel: tpu_custom_call.1
= control target key start
LH: loop header
LB: loop body
LE: loop exit
PB: predicated region body
PF: predicated region fallthrough
CT: control target
= control target key end

     0   :  { %vm41_vm0 = vcmask 261120   ;;  %s370_s0 = inlined_call_operand.vmem [shape: f32[48,32], index: 0, kind: input, shape index: {}]   ;;  %s371_s1 = inlined_call_operand.vmem [shape: f32[48,32], index: 1, kind: input, shape index: {}]   ;;  %s372_s2 = inlined_call_operand.hbm [shape: f32[1], index: 2, kind: output, shape index: {}]  }
   0x1   :  { %v24_v0 = vld [vmem:[%s370_s0 + $0x8] sm:$0xff]  ;;  %v25_v2 = vld [vmem:[%s370_s0 + $0x10] sm:$0xff]  ;;  %v23_v5 = vld [vmem:[%s370_s0] sm:$0xff] }
   0x2   :  { %v30_v1 = vld [vmem:[%s371_s1 + $0x8] sm:$0xff]  ;;  %v31_v4 = vld [vmem:[%s371_s1 + $0x10] sm:$0xff]  ;;  %v29_v6 = vld [vmem:[%s371_s1] sm:$0xff] }
   0x3   :  { %v36_v3 = vmul.f32 %v30_v1, %v24_v0  ;;  %v37_v7 = vmul.f32 %v31_v4, %v25_v2  ;;  %v35_v8 = vmul.f32 %v29_v6, %v23_v5  ;;  %v26_v9 = vld [vmem:[%s370_s0 + $0x18] sm:$0xff]  ;;  %v27_v11 = vld [vmem:[%s370_s0 + $0x20] sm:$0xff]  ;;  %v28_v15 = vld [vmem:[%s370_s0 + $0x28] sm:$0xff] }
   0x4   :  { %v32_v10 = vld [vmem:[%s371_s1 + $0x18] sm:$0xff]  ;;  %v33_v14 = vld [vmem:[%s371_s1 + $0x20] sm:$0xff]  ;;  %v34_v16 = vld [vmem:[%s371_s1 + $0x28] sm:$0xff] }
   0x5   :  { %v45_v12 = vsel %vm41_vm0, %v36_v3, 0.0  ;;  %v38_v13 = vmul.f32 %v32_v10, %v26_v9  ;;  %v48_v17 = vsel %vm41_vm0, %v37_v7, 0.0 }
   0x6   :  { %46 = vadd.xlane.f32.xlu0 %v45_v12 }
   0x7   :  { %7 = vsyncpa [#allocation4], 0  ;;  %49 = vadd.xlane.f32.xlu1 %v48_v17  ;;  %v42_v18 = vsel %vm41_vm0, %v35_v8, 0.0  ;;  %v39_v19 = vmul.f32 %v33_v14, %v27_v11  ;;  %v51_v20 = vsel %vm41_vm0, %v38_v13, 0.0  ;;  %v40_v21 = vmul.f32 %v34_v16, %v28_v15  ;;  %s291_s1 = smov [#allocation3]  }
   0x8   :  { %vm16_vm1 = vcmask 7168   ;;  %v290_v24 = vmov 0.0  }
   0x9   :  { %v54_v22 = vsel %vm41_vm0, %v39_v19, 0.0  ;;  %v57_v23 = vsel %vm41_vm0, %v40_v21, 0.0  ;;  %18 = vst.msk [vmem:[#allocation2 + $0x8] sm:$0xff] %vm16_vm1, %v290_v24  ;;  %17 = vst.msk [vmem:[#allocation2] sm:$0xff] %vm16_vm1, %v290_v24 }
   0xa   :  { %43 = vadd.xlane.f32.xlu0 %v42_v18  ;;  %19 = vst.msk [vmem:[#allocation2 + $0x10] sm:$0xff] %vm16_vm1, %v290_v24  ;;  %20 = vst.msk [vmem:[#allocation2 + $0x18] sm:$0xff] %vm16_vm1, %v290_v24 }
   0xb   :  { %52 = vadd.xlane.f32.xlu1 %v51_v20  ;;  %21 = vst.msk [vmem:[#allocation2 + $0x20] sm:$0xff] %vm16_vm1, %v290_v24  ;;  %22 = vst.msk [vmem:[#allocation2 + $0x28] sm:$0xff] %vm16_vm1, %v290_v24 }
   0xe   :  { %55 = vadd.xlane.f32.xlu0 %v54_v22 }
   0xf   :  { %58 = vadd.xlane.f32.xlu1 %v57_v23 }
  0x10   :  { %v166_v6 = vld [vmem:[#allocation2 + $0x8] sm:$0xff]  ;;  %v165_v12 = vld [vmem:[#allocation2] sm:$0xff] }
  0x11   :  { %v167_v9 = vld [vmem:[#allocation2 + $0x10] sm:$0xff]  ;;  %v168_v19 = vld [vmem:[#allocation2 + $0x18] sm:$0xff] }
  0x8f   :  { %v47_v25 = vpop.xlane.xlu0 %46 }
  0x90   :  { %v100_v26 = vsub.f32 0.0, %v47_v25  ;;  %v50_v27 = vpop.xlane.xlu1 %49  ;;  %v169_v25 = vld [vmem:[#allocation2 + $0x20] sm:$0xff] }
  0x91   :  { %v101_v28 = vsub.f32 0.0, %v50_v27 }
  0x92   :  { %v235_v29 = vmul.f32 -1.442695, %v100_v26 }
  0x93   :  { %v236_v30 = vmul.f32 -1.442695, %v101_v28  ;;  %v44_v31 = vpop.xlane.xlu0 %43  ;;  %v170_v28 = vld [vmem:[#allocation2 + $0x28] sm:$0xff] }
  0x94   :  { %244 = vpow2.f32 %v235_v29  ;;  %v234_v32 = vmul.f32 -1.442695, %v44_v31  ;;  %v53_v33 = vpop.xlane.xlu1 %52 }
  0x95   :  { %246 = vpow2.f32 %v236_v30  ;;  %v102_v34 = vsub.f32 0.0, %v53_v33 }
  0x96   :  { %248 = vpow2.f32 %v234_v32 }
  0x97   :  { %v237_v35 = vmul.f32 -1.442695, %v102_v34  ;;  %v56_v36 = vpop.xlane.xlu0 %55 }
  0x98   :  { %v103_v37 = vsub.f32 0.0, %v56_v36  ;;  %v59_v38 = vpop.xlane.xlu1 %58 }
  0x99   :  { %250 = vpow2.f32 %v237_v35  ;;  %v104_v39 = vsub.f32 0.0, %v59_v38 }
  0x9a   :  { %v238_v40 = vmul.f32 -1.442695, %v103_v37 }
  0x9b   :  { %v239_v41 = vmul.f32 -1.442695, %v104_v39 }
  0x9c   :  { %252 = vpow2.f32 %v238_v40 }
  0x9d   :  { %254 = vpow2.f32 %v239_v41 }
  0xa1   :  { %v245_v42 = vpop.eup %244 }
  0xa2   :  { %v247_v43 = vpop.eup %246  ;;  %v130_v44 = vadd.f32 1.0, %v245_v42 }
  0xa3   :  { %v249_v45 = vpop.eup %248  ;;  %v131_v46 = vadd.f32 1.0, %v247_v43 }
  0xa4   :  { %256 = vrcp.f32 %v130_v44  ;;  %v129_v47 = vadd.f32 1.0, %v249_v45 }
  0xa5   :  { %258 = vrcp.f32 %v131_v46 }
  0xa6   :  { %v251_v48 = vpop.eup %250  ;;  %260 = vrcp.f32 %v129_v47 }
  0xa7   :  { %v132_v49 = vadd.f32 1.0, %v251_v48 }
  0xa9   :  { %v253_v50 = vpop.eup %252  ;;  %262 = vrcp.f32 %v132_v49 }
  0xaa   :  { %v255_v51 = vpop.eup %254  ;;  %v133_v52 = vadd.f32 1.0, %v253_v50 }
  0xab   :  { %v134_v53 = vadd.f32 1.0, %v255_v51 }
  0xac   :  { %264 = vrcp.f32 %v133_v52 }
  0xad   :  { %266 = vrcp.f32 %v134_v53 }
  0xb1   :  { %v257_v54 = vpop.eup %256 }
  0xb2   :  { %v259_v55 = vpop.eup %258  ;;  %v148_v56 = vadd.f32 1e-08, %v257_v54 }
  0xb3   :  { %v261_v57 = vpop.eup %260  ;;  %v149_v58 = vadd.f32 1e-08, %v259_v55 }
  0xb4   :  { %268 = vlog2.f32 %v148_v56  ;;  %v147_v59 = vadd.f32 1e-08, %v261_v57 }
  0xb5   :  { %270 = vlog2.f32 %v149_v58 }
  0xb6   :  { %v263_v60 = vpop.eup %262  ;;  %272 = vlog2.f32 %v147_v59 }
  0xb7   :  { %v150_v61 = vadd.f32 1e-08, %v263_v60 }
  0xb9   :  { %v265_v62 = vpop.eup %264  ;;  %274 = vlog2.f32 %v150_v61 }
  0xba   :  { %v267_v63 = vpop.eup %266  ;;  %v151_v0 = vadd.f32 1e-08, %v265_v62 }
  0xbb   :  { %v152_v1 = vadd.f32 1e-08, %v267_v63 }
  0xbc   :  { %276 = vlog2.f32 %v151_v0 }
  0xbd   :  { %278 = vlog2.f32 %v152_v1 }
  0xc1   :  { %v269_v2 = vpop.eup %268 }
  0xc2   :  { %v271_v3 = vpop.eup %270  ;;  %v156_v4 = vmul.f32 0.6931472, %v269_v2 }
  0xc3   :  { %v273_v5 = vpop.eup %272  ;;  %v158_v7 = vmul.f32 0.6931472, %v271_v3 }
  0xc4   :  { %v172_v8 = vmul.f32 0.025, %v156_v4  ;;  %v154_v10 = vmul.f32 0.6931472, %v273_v5 }
  0xc5   :  { %v173_v11 = vmul.f32 0.025, %v158_v7 }
  0xc6   :  { %v275_v13 = vpop.eup %274  ;;  %v178_v14 = vadd.f32 %v172_v8, %v166_v6  ;;  %v171_v15 = vmul.f32 -0.125, %v154_v10 }
  0xc7   :  { %v179_v16 = vadd.f32 %v173_v11, %v167_v9  ;;  %v160_v17 = vmul.f32 0.6931472, %v275_v13 }
  0xc8   :  { %185 = vst.msk [vmem:[#allocation2 + $0x8] sm:$0xff] %vm16_vm1, %v178_v14  ;;  %v177_v18 = vadd.f32 %v171_v15, %v165_v12 }
  0xc9   :  { %v277_v20 = vpop.eup %276  ;;  %186 = vst.msk [vmem:[#allocation2 + $0x10] sm:$0xff] %vm16_vm1, %v179_v16  ;;  %v174_v21 = vmul.f32 0.025, %v160_v17 }
  0xca   :  { %v279_v22 = vpop.eup %278  ;;  %184 = vst.msk [vmem:[#allocation2] sm:$0xff] %vm16_vm1, %v177_v18  ;;  %v162_v23 = vmul.f32 0.6931472, %v277_v20 }
  0xcb   :  { %v180_v24 = vadd.f32 %v174_v21, %v168_v19  ;;  %v164_v26 = vmul.f32 0.6931472, %v279_v22 }
  0xcc   :  { %v175_v27 = vmul.f32 0.025, %v162_v23 }
  0xcd   :  { %187 = vst.msk [vmem:[#allocation2 + $0x18] sm:$0xff] %vm16_vm1, %v180_v24  ;;  %v176_v29 = vmul.f32 0.025, %v164_v26 }
  0xce   :  { %v181_v30 = vadd.f32 %v175_v27, %v169_v25 }
  0xcf   :  { %v182_v31 = vadd.f32 %v176_v29, %v170_v28  ;;  %v194_v32 = vld [vmem:[#allocation2 + $0x8] sm:$0xff] }
  0xd0   :  { %188 = vst.msk [vmem:[#allocation2 + $0x20] sm:$0xff] %vm16_vm1, %v181_v30  ;;  %v195_v34 = vld [vmem:[#allocation2 + $0x10] sm:$0xff]  ;;  %v200_v36 = vsel %vm16_vm1, %v194_v32, 0.0 }
  0xd1   :  { %189 = vst.msk [vmem:[#allocation2 + $0x28] sm:$0xff] %vm16_vm1, %v182_v31  ;;  %v193_v33 = vld [vmem:[#allocation2] sm:$0xff]  ;;  %v202_v39 = vsel %vm16_vm1, %v195_v34, 0.0 }
  0xd2   :  { %v199_v35 = vsel %vm16_vm1, %v193_v33, 0.0 }
  0xd3   :  { %v201_v37 = vadd.f32 %v200_v36, %v199_v35 }
  0xd4   :  { %v196_v38 = vld [vmem:[#allocation2 + $0x18] sm:$0xff] }
  0xd5   :  { %v203_v40 = vadd.f32 %v202_v39, %v201_v37  ;;  %v204_v41 = vsel %vm16_vm1, %v196_v38, 0.0 }
  0xd7   :  { %v197_v42 = vld [vmem:[#allocation2 + $0x20] sm:$0xff]  ;;  %v205_v43 = vadd.f32 %v204_v41, %v203_v40 }
  0xd8   :  { %v198_v44 = vld [vmem:[#allocation2 + $0x28] sm:$0xff]  ;;  %v206_v45 = vsel %vm16_vm1, %v197_v42, 0.0 }
  0xd9   :  { %v207_v46 = vadd.f32 %v206_v45, %v205_v43  ;;  %v208_v47 = vsel %vm16_vm1, %v198_v44, 0.0 }
  0xdb   :  { %v209_v48 = vadd.f32 %v208_v47, %v207_v46 }
  0xdd   :  { %210 = vadd.xlane.f32.xlu0 %v209_v48 }
 0x166   :  { %v211_v49 = vpop.xlane.xlu0 %210 }
 0x167   :  { %v212_v50 = vrot.slane %v211_v49, 4 }
 0x169   :  { %v213_v51 = vadd.f32 %v212_v50, %v211_v49 }
 0x16b   :  { %v214_v52 = vrot.slane %v213_v51, 2 }
 0x16d   :  { %v215_v53 = vadd.f32 %v214_v52, %v213_v51 }
 0x16f   :  { %v216_v54 = vrot.slane %v215_v53, 1 }
 0x171   :  { %v217_v55 = vadd.f32 %v216_v54, %v215_v53 }
 0x173   :  { %240 = vpush %v217_v55 }
 0x1a4   :  { %s241_s0 = spop %240 }
 0x1a5   :  { %220 = sst [smem:[#allocation3]] %s241_s0 }
 0x1a6   :  { %228 = dma.smem_to_hbm %s291_s1, 16, %s372_s2, [#allocation4]  }
 0x1a7   :  { %288 = dma.done.wait [#allocation4], 16  }
 0x1a8   :  { %289 = vsyncadd [#allocation4], 4294967280 }
 0x1a9   :  { %232 = sfence }
 0x1aa   :  { %233 = vsyncpa [#allocation4], 1 }

</bundles_post_ra>
